<compile_context>
chip_gen: v5e
topology: v5e:2x2
jax: 0.10.0
libtpu: 0.0.40
codegen_flags: <defaults>
</compile_context>

<pallas_src>
import functools

import jax
import jax.numpy as jnp
from jax.experimental import pallas as pl
from jax.experimental.pallas import tpu as pltpu


def _round_up(x, m):
    return (x + m - 1) // m * m


def _choose_block_n(n_pad, prefer=256):
    """Largest 128-multiple divisor of n_pad <= prefer, preferring >=2 lane tiles
    so the 'parallel' n axis can be megacore-sharded on v7x."""
    if n_pad <= 128:
        return n_pad
    best = 128
    cand = 256
    while cand <= min(prefer, n_pad):
        if n_pad % cand == 0 and n_pad // cand >= 2:
            best = cand
        cand += 128
    return best


def _choose_block_k(k_pad, prefer=512):
    """Largest 128-multiple divisor of k_pad <= prefer (bounds per-buffer VMEM)."""
    best = 128
    cand = 128
    while cand <= min(prefer, k_pad):
        if k_pad % cand == 0:
            best = cand
        cand += 128
    return best


def _switch_linear_kernel(vm_ref, ve_ref, vlo_ref, vhi_ref,
                          x_ref, w_ref, b_ref, o_ref, acc_ref):
    # x_ref: (block_m, block_k) bf16  rows of the expert-sorted batch (row tile vm[t])
    # w_ref: (block_k, block_n) bf16  pre-transposed weight slab of expert ve[t]
    # b_ref: (1, block_n)       f32   bias tile of expert ve[t]
    # o_ref: (block_m, block_n)       output row tile vm[t]
    # acc_ref: (block_m, block_n) f32 accumulator (persists across visits & K steps)
    t = pl.program_id(1)
    k = pl.program_id(2)
    nt = pl.num_programs(1)
    nk = pl.num_programs(2)

    block_m = x_ref.shape[0]
    vm_t = vm_ref[t]
    tile_start = vm_t * block_m

    first_visit = (t == 0) | (vm_ref[jnp.maximum(t - 1, 0)] != vm_t)
    last_visit = (t == nt - 1) | (vm_ref[jnp.minimum(t + 1, nt - 1)] != vm_t)
    last_k = k == nk - 1
    not_last_k = jnp.logical_not(last_k)

    # First K step of the first visit of this row tile -> reset the accumulator.
    @pl.when((k == 0) & first_visit)
    def _():
        acc_ref[...] = jnp.zeros_like(acc_ref)

    contrib = jnp.dot(x_ref[...], w_ref[...],
                      preferred_element_type=jnp.float32)

    # Fast path: every row of this tile belongs to expert ve[t] (common case).
    full_tile = (vlo_ref[t] == tile_start) & (vhi_ref[t] == tile_start + block_m)
    not_full = jnp.logical_not(full_tile)

    # Slow-path row mask: which rows of the tile belong to expert ve[t].
    rows = tile_start + jax.lax.broadcasted_iota(jnp.int32, (block_m, 1), 0)
    row_mask = (rows >= vlo_ref[t]) & (rows < vhi_ref[t])

    @pl.when(full_tile & not_last_k)
    def _():
        acc_ref[...] += contrib

    @pl.when(full_tile & last_k)
    def _():
        acc_ref[...] += contrib + b_ref[...]

    @pl.when(not_full & not_last_k)
    def _():
        acc_ref[...] += jnp.where(row_mask, contrib, 0.0)

    @pl.when(not_full & last_k)
    def _():
        # Each row belongs to exactly one expert, so its bias is added exactly once
        # (only on the visit whose mask owns the row).
        acc_ref[...] += jnp.where(row_mask, contrib + b_ref[...], 0.0)

    # Store once per output-tile residency (last K step of the last visit).
    @pl.when(last_k & last_visit)
    def _():
        o_ref[...] = acc_ref[...].astype(o_ref.dtype)


def _make_visit_metadata(indices, num_experts, block_m, num_m_tiles):
    """Per-visit metadata for the grouped matmul.

    A "visit" is one (row-tile, expert) pair whose row ranges intersect, listed in
    non-decreasing row-tile order.  Returns int32 arrays of static length
    num_m_tiles + num_experts - 1 (worst case), padded with no-op visits
    (empty row range on the last row tile).
    """
    e_ids = jnp.arange(num_experts, dtype=jnp.int32)
    sizes = jnp.sum((indices[None, :] == e_ids[:, None]).astype(jnp.int32), axis=1)
    ends = jnp.cumsum(sizes)                      # exclusive end row per expert
    starts = ends - sizes                         # start row per expert

    first_tile = starts // block_m
    last_tile = jnp.where(sizes > 0, (ends - 1) // block_m, first_tile)
    n_visits = jnp.where(sizes > 0, last_tile - first_tile + 1, 0)
    visit_end = jnp.cumsum(n_visits)
    visit_start = visit_end - n_visits
    total = visit_end[-1]

    max_visits = num_m_tiles + num_experts - 1
    t = jnp.arange(max_visits, dtype=jnp.int32)
    e_of_t = jnp.searchsorted(visit_end, t, side="right").astype(jnp.int32)
    e_of_t = jnp.minimum(e_of_t, num_experts - 1)

    j = t - visit_start[e_of_t]
    vm = first_tile[e_of_t] + j
    vlo = jnp.maximum(starts[e_of_t], vm * block_m)
    vhi = jnp.minimum(ends[e_of_t], (vm + 1) * block_m)

    valid = t < total
    vm = jnp.where(valid, vm, num_m_tiles - 1).astype(jnp.int32)
    ve = jnp.where(valid, e_of_t, 0).astype(jnp.int32)
    vlo = jnp.where(valid, vlo, 0).astype(jnp.int32)
    vhi = jnp.where(valid, vhi, 0).astype(jnp.int32)
    return vm, ve, vlo, vhi


def prepare_switch_linear_params(weight, bias, *, param_dtype=jnp.bfloat16):
    """One-time parameter prep, hoisted out of the per-call path.

    weight: (E, out_features, in_features) nn.Linear layout; bias: (E, out_features).
    Returns w_t: (E, K_pad, N_pad) in param_dtype (pre-transposed, padded to 128
    multiples) and bias3: (E, 1, N_pad) float32.
    """
    E, N, K = weight.shape
    k_pad = _round_up(K, 128)
    n_pad = _round_up(N, 128)
    w_t = jnp.swapaxes(weight, 1, 2)                      # (E, K, N)
    if (k_pad, n_pad) != (K, N):
        w_t = jnp.pad(w_t, ((0, 0), (0, k_pad - K), (0, n_pad - N)))
    w_t = w_t.astype(param_dtype)
    b3 = bias.astype(jnp.float32)
    if n_pad != N:
        b3 = jnp.pad(b3, ((0, 0), (0, n_pad - N)))
    return w_t, b3.reshape(E, 1, n_pad)


@functools.partial(jax.jit,
                   static_argnames=("out_features", "block_m", "block_n", "block_k"))
def switch_linear(x, indices, w_t, bias3, *, out_features,
                  block_m=128, block_n=None, block_k=None):
    """x: (B, in_features), indices: (B,) int32 in [0, E) (out-of-range is undefined,
    matching the PyTorch module); w_t/bias3 from prepare_switch_linear_params."""
    B, K = x.shape
    E, k_pad, n_pad = w_t.shape
    assert k_pad >= K and n_pad >= out_features

    indices = indices.astype(jnp.int32)

    # Tile sizes respecting the (8, 128) layout constraint.
    block_m = min(block_m, _round_up(B, 8))
    block_n = _choose_block_n(n_pad) if block_n is None else block_n
    block_k = _choose_block_k(k_pad) if block_k is None else block_k

    b_pad = _round_up(B, block_m)
    num_m_tiles = b_pad // block_m
    num_n_tiles = n_pad // block_n
    num_k_tiles = k_pad // block_k

    # Sort rows by expert so same-expert rows share one weight fetch per tile;
    # feed the MXU in bf16 (the dot accumulates in f32 inside the kernel).
    order = jnp.argsort(indices)
    x_sorted = jnp.take(x, order, axis=0).astype(w_t.dtype)
    x_sorted = jnp.pad(x_sorted, ((0, b_pad - B), (0, k_pad - K)))

    vm, ve, vlo, vhi = _make_visit_metadata(indices, E, block_m, num_m_tiles)
    num_visits = vm.shape[0]

    grid_spec = pltpu.PrefetchScalarGridSpec(
        num_scalar_prefetch=4,
        grid=(num_n_tiles, num_visits, num_k_tiles),
        in_specs=[
            # x rows of row tile vm[t], K slab k
            pl.BlockSpec((block_m, block_k),
                         lambda n, t, k, vm, ve, vlo, vhi: (vm[t], k)),
            # (block_k, block_n) weight slab of expert ve[t] (expert dim squeezed)
            # TODO(synk): sweep pipeline_mode=pl.Buffered(3) here once VMEM headroom
            #             is confirmed on v7x (hides expert-boundary weight DMA).
            pl.BlockSpec((None, block_k, block_n),
                         lambda n, t, k, vm, ve, vlo, vhi: (ve[t], k, n)),
            # (1, block_n) bias tile of expert ve[t]
            pl.BlockSpec((None, 1, block_n),
                         lambda n, t, k, vm, ve, vlo, vhi: (ve[t], 0, n)),
        ],
        out_specs=pl.BlockSpec((block_m, block_n),
                               lambda n, t, k, vm, ve, vlo, vhi: (vm[t], n)),
        scratch_shapes=[pltpu.VMEM((block_m, block_n), jnp.float32)],
    )

    out = pl.pallas_call(
        _switch_linear_kernel,
        out_shape=jax.ShapeDtypeStruct((b_pad, n_pad), x.dtype),
        grid_spec=grid_spec,
        compiler_params=pltpu.CompilerParams(
            dimension_semantics=("parallel", "arbitrary", "arbitrary")),
    )(vm, ve, vlo, vhi, x_sorted, w_t, bias3)

    # Undo the expert sort (scatter-built inverse, no second argsort) and drop padding.
    inv = jnp.zeros((B,), jnp.int32).at[order].set(jnp.arange(B, dtype=jnp.int32))
    return jnp.take(out[:B, :out_features], inv, axis=0)


def _reference(x, indices, weight, bias):
    w_sel = weight[indices]                        # (B, out, in)
    b_sel = bias[indices]                          # (B, out)
    y = jnp.einsum("bi,boi->bo", x, w_sel, preferred_element_type=jnp.float32)
    return y + b_sel.astype(jnp.float32)


if __name__ == "__main__":
    num_experts = 4
    in_features = 128
    out_features = 256

    key = jax.random.PRNGKey(0)
    kx, kw, kb, ki = jax.random.split(key, 4)

    # Deterministic Linear-like init: uniform in [-1/sqrt(in), 1/sqrt(in)].
    bound = 1.0 / jnp.sqrt(jnp.float32(in_features))
    weight = jax.random.uniform(kw, (num_experts, out_features, in_features),
                                jnp.float32, -bound, bound)
    bias = jax.random.uniform(kb, (num_experts, out_features),
                              jnp.float32, -bound, bound)

    # Parameter prep (transpose + pad + bf16) done ONCE, outside the per-call path.
    w_t, b3 = prepare_switch_linear_params(weight, bias)

    ok = True
    for batch, sub in ((16, 0), (13, 1)):  # second case exercises row padding
        kx_b = jax.random.fold_in(kx, sub)
        ki_b = jax.random.fold_in(ki, sub)
        x = jax.random.normal(kx_b, (batch, in_features), jnp.float32)
        indices = jax.random.randint(ki_b, (batch,), 0, num_experts, jnp.int32)

        y = switch_linear(x, indices, w_t, b3, out_features=out_features)
        y = jax.block_until_ready(y)
        assert y.shape == (batch, out_features)

        # Structural check against a bf16-consistent reference (tight) and the
        # original f32 module semantics (loose, bf16-quantization tolerance).
        y_bf16_ref = _reference(x.astype(jnp.bfloat16), indices,
                                weight.astype(jnp.bfloat16), bias)
        y_f32_ref = _reference(x, indices, weight, bias)
        ok = ok and bool(jnp.allclose(y, y_bf16_ref, atol=5e-3, rtol=5e-3))
        ok = ok and bool(jnp.allclose(y, y_f32_ref, atol=3e-2, rtol=3e-2))

    assert ok, "mismatch vs reference"
    print("KERNEL_OK")
</pallas_src>

<mosaic_0001>
module attributes {stable_mosaic.version = 11 : i64} {
  func.func @_switch_linear_kernel(%arg0: i32, %arg1: i32, %arg2: i32, %arg3: memref<4xi32, #tpu.memory_space<smem>>, %arg4: memref<4xi32, #tpu.memory_space<smem>>, %arg5: memref<4xi32, #tpu.memory_space<smem>>, %arg6: memref<4xi32, #tpu.memory_space<smem>>, %arg7: memref<16x128xbf16, #tpu.memory_space<vmem>>, %arg8: memref<1x128x128xbf16, #tpu.memory_space<vmem>>, %arg9: memref<1x1x128xf32, #tpu.memory_space<vmem>>, %arg10: memref<16x128xf32, #tpu.memory_space<vmem>>, %arg11: memref<16x128xf32, #tpu.memory_space<vmem>>) attributes {dimension_semantics = [#tpu.dimension_semantics<parallel>, #tpu.dimension_semantics<arbitrary>, #tpu.dimension_semantics<arbitrary>], iteration_bounds = array<i64: 2, 4, 1>, scalar_prefetch = 4 : i64, scratch_operands = 1 : i64, tpu.core_type = #tpu.core_type<tc>, window_params = [{transform_indices = @transform_0, window_bounds = array<i64: 16, 128>}, {transform_indices = @transform_1, window_bounds = array<i64: 1, 128, 128>}, {transform_indices = @transform_2, window_bounds = array<i64: 1, 1, 128>}, {transform_indices = @transform_3, window_bounds = array<i64: 16, 128>}]} {
    %0 = arith.index_cast %arg1 : i32 to index
    %1 = memref.load %arg3[%0] : memref<4xi32, #tpu.memory_space<smem>>
    %c16_i32 = arith.constant 16 : i32
    %2 = arith.muli %1, %c16_i32 : i32
    %c0_i32 = arith.constant 0 : i32
    %3 = arith.cmpi eq, %arg1, %c0_i32 : i32
    %c1_i32 = arith.constant 1 : i32
    %4 = arith.subi %arg1, %c1_i32 : i32
    %c0_i32_0 = arith.constant 0 : i32
    %5 = arith.maxsi %4, %c0_i32_0 : i32
    %6 = arith.index_cast %5 : i32 to index
    %7 = memref.load %arg3[%6] : memref<4xi32, #tpu.memory_space<smem>>
    %8 = arith.cmpi ne, %7, %1 : i32
    %9 = arith.ori %3, %8 : i1
    %c3_i32 = arith.constant 3 : i32
    %10 = arith.cmpi eq, %arg1, %c3_i32 : i32
    %c1_i32_1 = arith.constant 1 : i32
    %11 = arith.addi %arg1, %c1_i32_1 : i32
    %c3_i32_2 = arith.constant 3 : i32
    %12 = arith.minsi %11, %c3_i32_2 : i32
    %13 = arith.index_cast %12 : i32 to index
    %14 = memref.load %arg3[%13] : memref<4xi32, #tpu.memory_space<smem>>
    %15 = arith.cmpi ne, %14, %1 : i32
    %16 = arith.ori %10, %15 : i1
    %c0_i32_3 = arith.constant 0 : i32
    %17 = arith.cmpi eq, %arg2, %c0_i32_3 : i32
    %true = arith.constant true
    %18 = arith.xori %17, %true : i1
    %c0_i32_4 = arith.constant 0 : i32
    %19 = arith.cmpi eq, %arg2, %c0_i32_4 : i32
    %20 = arith.andi %19, %9 : i1
    %21 = arith.extui %20 : i1 to i32
    %c0_i32_5 = arith.constant 0 : i32
    %22 = arith.cmpi ne, %21, %c0_i32_5 : i32
    scf.if %22 {
      %cst_17 = arith.constant 0.000000e+00 : f32
      %63 = vector.broadcast %cst_17 : f32 to vector<16x128xf32>
      %c0_18 = arith.constant 0 : index
      %c0_19 = arith.constant 0 : index
      %64 = vector.load %arg11[%c0_18, %c0_19] : memref<16x128xf32, #tpu.memory_space<vmem>>, vector<16x128xf32>
      tpu.vector_store %arg11[%c0_18, %c0_19], %63 {strides = array<i32>} : memref<16x128xf32, #tpu.memory_space<vmem>>, vector<16x128xf32>,
    } else {
    }
    %c0 = arith.constant 0 : index
    %c0_6 = arith.constant 0 : index
    %23 = vector.load %arg7[%c0, %c0_6] : memref<16x128xbf16, #tpu.memory_space<vmem>>, vector<16x128xbf16>
    %c0_7 = arith.constant 0 : index
    %c0_8 = arith.constant 0 : index
    %c0_9 = arith.constant 0 : index
    %24 = vector.load %arg8[%c0_7, %c0_8, %c0_9] : memref<1x128x128xbf16, #tpu.memory_space<vmem>>, vector<1x128x128xbf16>
    %25 = vector.shape_cast %24 : vector<1x128x128xbf16> to vector<128x128xbf16>
    %cst = arith.constant dense<0.000000e+00> : vector<16x128xf32>
    %26 = tpu.matmul %23, %25, %cst {dimension_numbers = #tpu.dot_dimension_numbers<[1], [0], [0], [1], [0, 0, 1, 1], [], []>} : vector<16x128xbf16>, vector<128x128xbf16>, vector<16x128xf32> -> vector<16x128xf32>
    %27 = arith.index_cast %arg1 : i32 to index
    %28 = memref.load %arg5[%27] : memref<4xi32, #tpu.memory_space<smem>>
    %29 = arith.cmpi eq, %28, %2 : i32
    %30 = arith.index_cast %arg1 : i32 to index
    %31 = memref.load %arg6[%30] : memref<4xi32, #tpu.memory_space<smem>>
    %c16_i32_10 = arith.constant 16 : i32
    %32 = arith.addi %2, %c16_i32_10 : i32
    %33 = arith.cmpi eq, %31, %32 : i32
    %34 = arith.andi %29, %33 : i1
    %true_11 = arith.constant true
    %35 = arith.xori %34, %true_11 : i1
    %36 = tpu.iota {dimensions = array<i32: 0>} : vector<16x1xi32>
    %37 = vector.broadcast %2 : i32 to vector<16x1xi32>
    %38 = arith.addi %37, %36 : vector<16x1xi32>
    %39 = arith.index_cast %arg1 : i32 to index
    %40 = memref.load %arg5[%39] : memref<4xi32, #tpu.memory_space<smem>>
    %41 = vector.broadcast %40 : i32 to vector<16x1xi32>
    %42 = arith.cmpi sge, %38, %41 : vector<16x1xi32>
    %43 = arith.index_cast %arg1 : i32 to index
    %44 = memref.load %arg6[%43] : memref<4xi32, #tpu.memory_space<smem>>
    %45 = vector.broadcast %44 : i32 to vector<16x1xi32>
    %46 = arith.cmpi slt, %38, %45 : vector<16x1xi32>
    %47 = arith.andi %42, %46 : vector<16x1xi1>
    %48 = arith.andi %34, %18 : i1
    %49 = arith.extui %48 : i1 to i32
    %c0_i32_12 = arith.constant 0 : i32
    %50 = arith.cmpi ne, %49, %c0_i32_12 : i32
    scf.if %50 {
      %c0_17 = arith.constant 0 : index
      %c0_18 = arith.constant 0 : index
      %63 = vector.load %arg11[%c0_17, %c0_18] : memref<16x128xf32, #tpu.memory_space<vmem>>, vector<16x128xf32>
      %64 = arith.addf %63, %26 : vector<16x128xf32>
      %c0_19 = arith.constant 0 : index
      %c0_20 = arith.constant 0 : index
      %65 = vector.load %arg11[%c0_19, %c0_20] : memref<16x128xf32, #tpu.memory_space<vmem>>, vector<16x128xf32>
      tpu.vector_store %arg11[%c0_19, %c0_20], %64 {strides = array<i32>} : memref<16x128xf32, #tpu.memory_space<vmem>>, vector<16x128xf32>,
    } else {
    }
    %51 = arith.andi %34, %17 : i1
    %52 = arith.extui %51 : i1 to i32
    %c0_i32_13 = arith.constant 0 : i32
    %53 = arith.cmpi ne, %52, %c0_i32_13 : i32
    scf.if %53 {
      %c0_17 = arith.constant 0 : index
      %c0_18 = arith.constant 0 : index
      %63 = vector.load %arg11[%c0_17, %c0_18] : memref<16x128xf32, #tpu.memory_space<vmem>>, vector<16x128xf32>
      %c0_19 = arith.constant 0 : index
      %c0_20 = arith.constant 0 : index
      %c0_21 = arith.constant 0 : index
      %64 = vector.load %arg9[%c0_19, %c0_20, %c0_21] : memref<1x1x128xf32, #tpu.memory_space<vmem>>, vector<1x1x128xf32>
      %65 = vector.shape_cast %64 : vector<1x1x128xf32> to vector<1x128xf32>
      %66 = vector.broadcast %65 : vector<1x128xf32> to vector<16x128xf32>
      %67 = arith.addf %26, %66 : vector<16x128xf32>
      %68 = arith.addf %63, %67 : vector<16x128xf32>
      %c0_22 = arith.constant 0 : index
      %c0_23 = arith.constant 0 : index
      %69 = vector.load %arg11[%c0_22, %c0_23] : memref<16x128xf32, #tpu.memory_space<vmem>>, vector<16x128xf32>
      tpu.vector_store %arg11[%c0_22, %c0_23], %68 {strides = array<i32>} : memref<16x128xf32, #tpu.memory_space<vmem>>, vector<16x128xf32>,
    } else {
    }
    %54 = arith.andi %35, %18 : i1
    %55 = arith.extui %54 : i1 to i32
    %c0_i32_14 = arith.constant 0 : i32
    %56 = arith.cmpi ne, %55, %c0_i32_14 : i32
    scf.if %56 {
      %c0_17 = arith.constant 0 : index
      %c0_18 = arith.constant 0 : index
      %63 = vector.load %arg11[%c0_17, %c0_18] : memref<16x128xf32, #tpu.memory_space<vmem>>, vector<16x128xf32>
      %cst_19 = arith.constant 0.000000e+00 : f32
      %64 = vector.shape_cast %47 : vector<16x1xi1> to vector<16x1xi1>
      %65 = vector.broadcast %64 : vector<16x1xi1> to vector<16x128xi1>
      %66 = vector.broadcast %cst_19 : f32 to vector<16x128xf32>
      %67 = arith.select %65, %26, %66 : vector<16x128xi1>, vector<16x128xf32>
      %68 = arith.addf %63, %67 : vector<16x128xf32>
      %c0_20 = arith.constant 0 : index
      %c0_21 = arith.constant 0 : index
      %69 = vector.load %arg11[%c0_20, %c0_21] : memref<16x128xf32, #tpu.memory_space<vmem>>, vector<16x128xf32>
      tpu.vector_store %arg11[%c0_20, %c0_21], %68 {strides = array<i32>} : memref<16x128xf32, #tpu.memory_space<vmem>>, vector<16x128xf32>,
    } else {
    }
    %57 = arith.andi %35, %17 : i1
    %58 = arith.extui %57 : i1 to i32
    %c0_i32_15 = arith.constant 0 : i32
    %59 = arith.cmpi ne, %58, %c0_i32_15 : i32
    scf.if %59 {
      %c0_17 = arith.constant 0 : index
      %c0_18 = arith.constant 0 : index
      %63 = vector.load %arg11[%c0_17, %c0_18] : memref<16x128xf32, #tpu.memory_space<vmem>>, vector<16x128xf32>
      %c0_19 = arith.constant 0 : index
      %c0_20 = arith.constant 0 : index
      %c0_21 = arith.constant 0 : index
      %64 = vector.load %arg9[%c0_19, %c0_20, %c0_21] : memref<1x1x128xf32, #tpu.memory_space<vmem>>, vector<1x1x128xf32>
      %65 = vector.shape_cast %64 : vector<1x1x128xf32> to vector<1x128xf32>
      %66 = vector.broadcast %65 : vector<1x128xf32> to vector<16x128xf32>
      %67 = arith.addf %26, %66 : vector<16x128xf32>
      %cst_22 = arith.constant 0.000000e+00 : f32
      %68 = vector.shape_cast %47 : vector<16x1xi1> to vector<16x1xi1>
      %69 = vector.broadcast %68 : vector<16x1xi1> to vector<16x128xi1>
      %70 = vector.broadcast %cst_22 : f32 to vector<16x128xf32>
      %71 = arith.select %69, %67, %70 : vector<16x128xi1>, vector<16x128xf32>
      %72 = arith.addf %63, %71 : vector<16x128xf32>
      %c0_23 = arith.constant 0 : index
      %c0_24 = arith.constant 0 : index
      %73 = vector.load %arg11[%c0_23, %c0_24] : memref<16x128xf32, #tpu.memory_space<vmem>>, vector<16x128xf32>
      tpu.vector_store %arg11[%c0_23, %c0_24], %72 {strides = array<i32>} : memref<16x128xf32, #tpu.memory_space<vmem>>, vector<16x128xf32>,
    } else {
    }
    %60 = arith.andi %17, %16 : i1
    %61 = arith.extui %60 : i1 to i32
    %c0_i32_16 = arith.constant 0 : i32
    %62 = arith.cmpi ne, %61, %c0_i32_16 : i32
    scf.if %62 {
      %c0_17 = arith.constant 0 : index
      %c0_18 = arith.constant 0 : index
      %63 = vector.load %arg11[%c0_17, %c0_18] : memref<16x128xf32, #tpu.memory_space<vmem>>, vector<16x128xf32>
      %c0_19 = arith.constant 0 : index
      %c0_20 = arith.constant 0 : index
      %64 = vector.load %arg10[%c0_19, %c0_20] : memref<16x128xf32, #tpu.memory_space<vmem>>, vector<16x128xf32>
      tpu.vector_store %arg10[%c0_19, %c0_20], %63 {strides = array<i32>} : memref<16x128xf32, #tpu.memory_space<vmem>>, vector<16x128xf32>,
    } else {
    }
    return
  }
  func.func @transform_0(%arg0: i32, %arg1: i32, %arg2: i32, %arg3: memref<4xi32, #tpu.memory_space<smem>>, %arg4: memref<4xi32, #tpu.memory_space<smem>>, %arg5: memref<4xi32, #tpu.memory_space<smem>>, %arg6: memref<4xi32, #tpu.memory_space<smem>>) -> (i32, i32) {
    %0 = arith.index_cast %arg1 : i32 to index
    %1 = memref.load %arg3[%0] : memref<4xi32, #tpu.memory_space<smem>>
    %c0_i32 = arith.constant 0 : i32
    return %1, %arg2 : i32, i32
  }
  func.func @transform_1(%arg0: i32, %arg1: i32, %arg2: i32, %arg3: memref<4xi32, #tpu.memory_space<smem>>, %arg4: memref<4xi32, #tpu.memory_space<smem>>, %arg5: memref<4xi32, #tpu.memory_space<smem>>, %arg6: memref<4xi32, #tpu.memory_space<smem>>) -> (i32, i32, i32) {
    %0 = arith.index_cast %arg1 : i32 to index
    %1 = memref.load %arg4[%0] : memref<4xi32, #tpu.memory_space<smem>>
    %c0_i32 = arith.constant 0 : i32
    return %1, %arg2, %arg0 : i32, i32, i32
  }
  func.func @transform_2(%arg0: i32, %arg1: i32, %arg2: i32, %arg3: memref<4xi32, #tpu.memory_space<smem>>, %arg4: memref<4xi32, #tpu.memory_space<smem>>, %arg5: memref<4xi32, #tpu.memory_space<smem>>, %arg6: memref<4xi32, #tpu.memory_space<smem>>) -> (i32, i32, i32) {
    %0 = arith.index_cast %arg1 : i32 to index
    %1 = memref.load %arg4[%0] : memref<4xi32, #tpu.memory_space<smem>>
    %c0_i32 = arith.constant 0 : i32
    %c0_i32_0 = arith.constant 0 : i32
    return %1, %c0_i32, %arg0 : i32, i32, i32
  }
  func.func @transform_3(%arg0: i32, %arg1: i32, %arg2: i32, %arg3: memref<4xi32, #tpu.memory_space<smem>>, %arg4: memref<4xi32, #tpu.memory_space<smem>>, %arg5: memref<4xi32, #tpu.memory_space<smem>>, %arg6: memref<4xi32, #tpu.memory_space<smem>>) -> (i32, i32) {
    %0 = arith.index_cast %arg1 : i32 to index
    %1 = memref.load %arg3[%0] : memref<4xi32, #tpu.memory_space<smem>>
    %c0_i32 = arith.constant 0 : i32
    return %1, %arg0 : i32, i32
  }
}

</mosaic_0001>

<bundles_post_ra>
// kernel: custom-call.1
= control target key start
LH: loop header
LB: loop body
LE: loop exit
PB: predicated region body
PF: predicated region fallthrough
CT: control target
= control target key end

     0   :  { %s6_s0 = inlined_call_operand.vmem [shape: u32[4], index: 0, kind: output, shape index: {}]  }

// kernel: switch_linear.1
= control target key start
LH: loop header
LB: loop body
LE: loop exit
PB: predicated region body
PF: predicated region fallthrough
CT: control target
= control target key end

     0   :  { %s1042_s30 = smov [#allocation4]   ;;  %s1043_s8 = smov [#allocation5]   ;;  %s1333_s0 = inlined_call_operand.vmem [shape: s32[4], index: 0, kind: input, shape index: {}]   ;;  %s1334_s4 = inlined_call_operand.vmem [shape: bf16[16,128], index: 4, kind: input, shape index: {}]   ;;  %s1335_s5 = inlined_call_operand.vmem [shape: bf16[4,128,256], index: 5, kind: input, shape index: {}]   ;;  %s1336_s6 = inlined_call_operand.vmem [shape: f32[4,1,256], index: 6, kind: input, shape index: {}]   ;;  %s1337_s7 = inlined_call_operand.vmem [shape: f32[16,256], index: 7, kind: output, shape index: {}]   ;;  %s1338_s1 = inlined_call_operand.vmem [shape: s32[4], index: 1, kind: input, shape index: {}]   ;;  %s1339_s2 = inlined_call_operand.vmem [shape: s32[4], index: 2, kind: input, shape index: {}]   ;;  %s1340_s3 = inlined_call_operand.vmem [shape: s32[4], index: 3, kind: input, shape index: {}]  }
   0x1   :  { %1345 = sst [smem:[#allocation15_spill]] %s1335_s5  ;;  %s13_s26 = sshll.u32 %s1333_s0, 4  ;;  %s14_s26 = int_to_ptr.vmem [resolvable:$true] %s13_s26 }
   0x2   :  { %s18_s29 = sshll.u32 %s1338_s1, 4  ;;  %s23_s11 = sshll.u32 %s1339_s2, 4  ;;  %s19_s29 = int_to_ptr.vmem [resolvable:$true] %s18_s29  ;;  %s24_s11 = int_to_ptr.vmem [resolvable:$true] %s23_s11 }
   0x3   :  { %16 = dma.vmem_to_smem %s14_s26, 16, %s1042_s30, [#allocation3] }
   0x4   :  { %21 = dma.vmem_to_smem %s19_s29, 16, %s1043_s8, [#allocation3] }
   0x5   :  { %s28_s14 = sshll.u32 %s1340_s3, 4  ;;  %s1044_s0 = smov [#allocation6]   ;;  %s29_s14 = int_to_ptr.vmem [resolvable:$true] %s28_s14 }
   0x6   :  { %26 = dma.vmem_to_smem %s24_s11, 16, %s1044_s0, [#allocation3] }
   0x7   :  { %s1045_s15 = smov [#allocation7]  }
   0x8   :  { %31 = dma.vmem_to_smem %s29_s14, 16, %s1045_s15, [#allocation3] }
   0x9   :  { %1004 = dma.done.wait [#allocation3], 64 }
   0xa   :  { %1005 = vsyncadd [#allocation3], 4294967232 }
   0xb   :  { %34 = sfence }
   0xc   :  { %s1099_s1 = smov 0   ;;  %s1101_s16 = smov 0  }
   0xd   :  { %s1103_s17 = smov 0   ;;  %s1105_s2 = smov 0  }
   0xe   :  { %s1107_s18 = smov 0   ;;  %s1109_s19 = smov 0  }
   0xf   :  { %s1111_s3 = smov 0   ;;  %s1113_s20 = smov 0  }
  0x10   :  { %s1115_s21 = smov 0  }
  0x11 LB: > { %1346 = sst [smem:[#allocation11_spill]] %s1032_s3  ;;  %s55_s22 = sadd.s32 1, %s1032_s3  ;;  %s1040_s21 = sphi %s1115_s21, %s40_s21   ;;  %s1036_s20 = sphi %s1113_s20, %s1366_s20   ;;  %s1032_s3 = sphi %s1111_s3, %s1365_s3   ;;  %s1028_s19 = sphi %s1109_s19, %s1364_s19   ;;  %s1024_s18 = sphi %s1107_s18, %s1363_s18   ;;  %s1020_s2 = sphi %s1105_s2, %s1370_s2   ;;  %s1016_s17 = sphi %s1103_s17, %s1369_s17   ;;  %s1012_s16 = sphi %s1101_s16, %s1368_s16   ;;  %s1008_s1 = sphi %s1099_s1, %s1367_s1  }
  0x12   : > { %1347 = sst [smem:[#allocation12_spill]] %s1036_s20  ;;  %p57_p0 = scmp.ge.s32.totalorder %s55_s22, 4 }
  0x13   : > { %s59_s23 = sadd.s32 1, %s1036_s20  ;;  %s93_s24 = sld [smem:[#allocation5 + %s1032_s3]] }
  0x14   : > { %s1372_s22 = smov (%p57_p0, %s55_s22), 0  ;;  %s1374_s23 = smov (!%p57_p0, %s59_s23), %s1036_s20 }
  0x15   : > { %1348 = sst [smem:[#allocation13_spill]] %s1372_s22  ;;  %p109_p1 = scmp.ne.s32.totalorder %s1020_s2, %s1016_s17 }
  0x16   : > { %s94_s25 = sld [smem:[#allocation5 + %s1372_s22]]  ;;  %p61_p2 = scmp.ge.s32.totalorder %s1374_s23, 2 }
  0x17   : > { %p110_p3 = scmp.eq.s32.totalorder %s1040_s21, 0  ;;  %s770_s26 = sadd.s32 4294967295, %s1040_s21  }
  0x18   : > { %s155_s27 = sld [smem:[#allocation4 + %s1032_s3]]  ;;  %s1376_s23 = smov (%p61_p2, %s1374_s23), 0 }
  0x19   : > { %1349 = sst [smem:[#allocation14_spill]] %s1376_s23  ;;  %p1158_p4 = por %p110_p3, %p109_p1 }
  0x1a   : > { %s156_s29 = sld [smem:[#allocation4 + %s1372_s22]]  ;;  %s98_s30 = ssub.s32 %s1036_s20, %s1376_s23 }
  0x1b   : > { %p172_p5 = scmp.ne.s32.totalorder %s1012_s16, %s1008_s1  ;;  %p173_p6 = scmp.eq.s32.totalorder %s770_s26, 7 }
  0x1c   : > { %s95_s8 = ssub.s32 %s93_s24, %s94_s25  ;;  %s102_s10 = sadd.s32 1, %s1020_s2 }
  0x1d   : > { %s99_s9 = sor.u32 %s98_s30, %s95_s8  ;;  %p1168_p8 = por %p173_p6, %p172_p5 }
  0x1e   : > { %p100_p7 = scmp.eq.s32.totalorder %s99_s9, 0  ;;  %s162_s0 = sadd.s32 1, %s1012_s16 }
  0x1f   : > { %p773_p10 = scmp.ge.s32.totalorder %s1040_s21, 8 }
  0x20   : > { %s1173_s12 = scalar_select %p100_p7, %s1020_s2, %s102_s10  }
  0x21   : > { %s157_s13 = ssub.s32 %s155_s27, %s156_s29  ;;  %195 = sbr.rel (%p773_p10) target bundleno = 65 (0x41), region = 16 }
  0x22   : > { %s159_s14 = sor.u32 %s157_s13, %s98_s30 }
  0x23   : > { %p160_p9 = scmp.eq.s32.totalorder %s159_s14, 0 }
  0x25   : > { %s1177_s15 = scalar_select %p160_p9, %s1012_s16, %s162_s0  }
  0x26   : > { %212 = sbr.rel (!%p1158_p4) target bundleno = 65 (0x41), region = 24  ;;  %s217_s24 = sld [smem:[#allocation5 + %s1032_s3]] (%p1158_p4) }
  0x27   : > { %s214_s25 = sand.u32 (%p1158_p4), 1, %s1020_s2   ;;  %s1352_s5 = sld [smem:[#allocation15_spill]] (%p1158_p4) }
  0x28   : > { %s774_s26 = sshll.u32 (%p1158_p4), %s214_s25, 6 }
  0x29   : > { %s216_s28 = scalar_lea.vmem (%p1158_p4), [#allocation8], %s774_s26 }
  0x2c   : > { %s775_s8 = sshll.u32 %s217_s24, 5 }
  0x2d   : > { %s222_s9 = sadd.s32 %s1036_s20, %s775_s8 }
  0x2e   : > { %s776_s27 = sshll.u32 %s222_s9, 2 }
  0x2f   : > { %s1188_s10 = scalar_lea.vmem %s1352_s5, %s776_s27 }
  0x30   : > { %v241_v0 = vld [vmem:[%s1188_s10] sm:$0xf]  ;;  %v243_v1 = vld [vmem:[%s1188_s10 + $0x8] sm:$0xf]  ;;  %v245_v2 = vld [vmem:[%s1188_s10 + $0x10] sm:$0xf] }
  0x31   : > { %242 = vst [vmem:[%s216_s28] sm:$0xf] %v241_v0  ;;  %v247_v3 = vld [vmem:[%s1188_s10 + $0x18] sm:$0xf]  ;;  %v249_v4 = vld [vmem:[%s1188_s10 + $0x20] sm:$0xf] }
  0x32   : > { %244 = vst [vmem:[%s216_s28 + $0x4] sm:$0xf] %v243_v1  ;;  %v251_v5 = vld [vmem:[%s1188_s10 + $0x28] sm:$0xf]  ;;  %v253_v6 = vld [vmem:[%s1188_s10 + $0x30] sm:$0xf] }
  0x33   : > { %246 = vst [vmem:[%s216_s28 + $0x8] sm:$0xf] %v245_v2  ;;  %v255_v7 = vld [vmem:[%s1188_s10 + $0x38] sm:$0xf]  ;;  %v257_v8 = vld [vmem:[%s1188_s10 + $0x40] sm:$0xf] }
  0x34   : > { %248 = vst [vmem:[%s216_s28 + $0xc] sm:$0xf] %v247_v3  ;;  %v259_v9 = vld [vmem:[%s1188_s10 + $0x48] sm:$0xf]  ;;  %v261_v10 = vld [vmem:[%s1188_s10 + $0x50] sm:$0xf] }
  0x35   : > { %250 = vst [vmem:[%s216_s28 + $0x10] sm:$0xf] %v249_v4  ;;  %v263_v11 = vld [vmem:[%s1188_s10 + $0x58] sm:$0xf]  ;;  %v265_v12 = vld [vmem:[%s1188_s10 + $0x60] sm:$0xf] }
  0x36   : > { %252 = vst [vmem:[%s216_s28 + $0x14] sm:$0xf] %v251_v5  ;;  %v267_v13 = vld [vmem:[%s1188_s10 + $0x68] sm:$0xf]  ;;  %v269_v14 = vld [vmem:[%s1188_s10 + $0x70] sm:$0xf] }
  0x37   : > { %254 = vst [vmem:[%s216_s28 + $0x18] sm:$0xf] %v253_v6  ;;  %v271_v15 = vld [vmem:[%s1188_s10 + $0x78] sm:$0xf] }
  0x38   : > { %256 = vst [vmem:[%s216_s28 + $0x1c] sm:$0xf] %v255_v7 }
  0x39   : > { %258 = vst [vmem:[%s216_s28 + $0x20] sm:$0xf] %v257_v8 }
  0x3a   : > { %260 = vst [vmem:[%s216_s28 + $0x24] sm:$0xf] %v259_v9 }
  0x3b   : > { %262 = vst [vmem:[%s216_s28 + $0x28] sm:$0xf] %v261_v10 }
  0x3c   : > { %264 = vst [vmem:[%s216_s28 + $0x2c] sm:$0xf] %v263_v11 }
  0x3d   : > { %266 = vst [vmem:[%s216_s28 + $0x30] sm:$0xf] %v265_v12 }
  0x3e   : > { %268 = vst [vmem:[%s216_s28 + $0x34] sm:$0xf] %v267_v13 }
  0x3f   : > { %270 = vst [vmem:[%s216_s28 + $0x38] sm:$0xf] %v269_v14 }
  0x40   : > { %272 = vst [vmem:[%s216_s28 + $0x3c] sm:$0xf] %v271_v15 }
  0x41 PF: > { %p777_p11 = scmp.ge.s32.totalorder %s1040_s21, 1  ;;  %p339_p12 = scmp.lt.s32.totalorder %s1040_s21, 9 }
  0x43   : > { %p340_p13 = pnand %p777_p11, %p339_p12 }
  0x44   : > { %s346_s13 = sand.u32 (!%p340_p13), 1, %s1016_s17   ;;  %s382_s14 = sand.u32 (!%p340_p13), 1, %s1008_s1  }
  0x45   : > { %343 = sbr.rel (%p340_p13) target bundleno = 295 (0x127), region = 69  ;;  %s1210_s0 = sshll.u32 (!%p340_p13), %s346_s13, 6 }
  0x46   : > { %s1212_s24 = sshll.u32 (!%p340_p13), %s382_s14, 4  ;;  %s385_s25 = sld [smem:[#allocation4 + %s1024_s18]] (!%p340_p13) }
  0x47   : > { %p401_p0 = scmp.lt.s32.totalorder (!%p340_p13), %s1028_s19, 1  ;;  %s398_s26 = sld [smem:[#allocation5 + %s1024_s18]] (!%p340_p13) }
  0x48   : > { %s784_s9 = sadd.s32 (!%p340_p13), 4294967295, %s1024_s18  ;;  %s409_s27 = sld [smem:[#allocation4 + %s1024_s18]] (!%p340_p13) }
  0x49   : > { %p413_p1 = scmp.gt.s32.totalorder (!%p340_p13), %s784_s9, 0  ;;  %s419_s29 = sadd.s32 (!%p340_p13), 1, %s1024_s18 }
  0x4a   : > { %s402_s8 = scalar_select %p401_p0, %s1028_s19, 1 }
  0x4b   : > { %p420_p2 = scmp.lt.s32.totalorder %s419_s29, 3  ;;  %s1378_s9 = smov (!%p413_p1, %s784_s9), 0 }
  0x4c   : > { %s780_s30 = sshll.u32 %s385_s25, 1  ;;  %s415_s25 = sld [smem:[#allocation4 + %s1378_s9]] }
  0x4d   : > { %p387_p3 = scmp.lt.s32.totalorder %s780_s30, 1  ;;  %p399_p4 = scmp.lt.s32.totalorder %s398_s26, 3 }
  0x4e   : > { %s1221_s17 = sshll.u32 %s409_s27, 4  ;;  %s1384_s29 = smov (!%p420_p2, %s419_s29), 3 }
  0x4f   : > { %s1380_s30 = smov (!%p387_p3, %s780_s30), 1  ;;  %s1382_s26 = smov (!%p399_p4, %s398_s26), 3 }
  0x50   : > { %s781_s1 = sshll.u32 %s1380_s30, 2  ;;  %s782_s14 = sshll.u32 %s1382_s26, 1 }
  0x51   : > { %s1226_s13 = scalar_lea.vmem %s1334_s4, %s781_s1  ;;  %s404_s5 = sadd.s32 %s782_s14, %s402_s8 }
  0x52   : > { %s1231_s20 = scalar_lea.vmem %s1336_s6, %s404_s5  ;;  %p411_p5 = scmp.eq.s32.totalorder %s1024_s18, 0 }
  0x53   : > { %s422_s3 = sld [smem:[#allocation4 + %s1384_s29]]  ;;  %p416_p6 = scmp.ne.s32.totalorder %s415_s25, %s409_s27 }
  0x54   : > { %p418_p9 = scmp.eq.s32.totalorder %s1024_s18, 3  ;;  %s348_s1 = scalar_lea.vmem [#allocation8], %s1210_s0 }
  0x55   : > { %p417_p7 = por %p416_p6, %p411_p5  ;;  %s1241_s26 = scalar_lea.vmem [#allocation9], %s1212_s24 }
  0x56   : > { %v1046_v16 = vmov (%p417_p7), 0.0  }
  0x57   : > { %430 = sbr.rel (!%p417_p7) target bundleno = 92 (0x5c), region = 77  ;;  %431 = vst [vmem:[#allocation2] sm:$0xff] (%p417_p7), %v1046_v16 }
  0x58   : > { %432 = vst [vmem:[#allocation2 + $0x8] sm:$0xff] (%p417_p7), %v1046_v16 }
  0x59   : > { %p423_p10 = scmp.ne.s32.totalorder %s422_s3, %s409_s27 }
  0x5b   : > { %p1235_p11 = por %p423_p10, %p418_p9 }
  0x5c PF: > { %v839_v17 = vld [vmem:[%s348_s1 + $0x38] sm:$0xff]  ;;  %v838_v18 = vld [vmem:[%s348_s1 + $0x30] sm:$0xff]  ;;  %v837_v19 = vld [vmem:[%s348_s1 + $0x28] sm:$0xff]  ;;  %s519_s5 = sld [smem:[#allocation6 + %s1024_s18]]  ;;  %s522_s22 = sadd.s32 16, %s1221_s17  ;;  %v527_v26 = vlaneseq  ;;  %v530_v29 = vstv %s1221_s17 }
  0x5d   : > { %505 = vmatpush.bf16.msra.mxu0 %v839_v17  ;;  %v836_v20 = vld [vmem:[%s348_s1 + $0x20] sm:$0xff]  ;;  %v835_v21 = vld [vmem:[%s348_s1 + $0x18] sm:$0xff]  ;;  %v834_v22 = vld [vmem:[%s348_s1 + $0x10] sm:$0xff]  ;;  %s521_s3 = sld [smem:[#allocation7 + %s1024_s18]] }
  0x5e   : > { %v833_v23 = vld [vmem:[%s348_s1 + $0x8] sm:$0xff]  ;;  %v832_v24 = vld [vmem:[%s348_s1] sm:$0xff]  ;;  %v831_v25 = vld [vmem:[%s1226_s13] sm:$0xff]  ;;  %v528_v27 = vshrl.u32 %v527_v26, 7 }
  0x60   : > { %v529_v28 = vadd.s32 8, %v528_v27  ;;  %v531_v30 = vadd.s32 %v530_v29, %v528_v27 }
  0x61   : > { %506 = vmatpush.bf16.msra.mxu0 %v838_v18 }
  0x62   : > { %p520_p12 = scmp.eq.s32.totalorder %s519_s5, %s1221_s17  ;;  %v532_v31 = vadd.s32 %v530_v29, %v529_v28  ;;  %v533_v32 = vstv %s519_s5 }
  0x63   : > { %p523_p13 = scmp.eq.s32.totalorder %s521_s3, %s522_s22  ;;  %v536_v33 = vstv %s521_s3  ;;  %vm1253_vm0 = vcmp.ge.s32.totalorder %v531_v30, %v533_v32 }
  0x64   : > { %vm1257_vm1 = vcmp.ge.s32.totalorder %v532_v31, %v533_v32  ;;  %vm1261_vm2 = vcmp.lt.s32.totalorder %v531_v30, %v536_v33  ;;  %vm1265_vm3 = vcmp.lt.s32.totalorder %v532_v31, %v536_v33 }
  0x65   : > { %507 = vmatpush.bf16.msra.mxu0 %v837_v19  ;;  %p1248_p0 = pnand %p523_p13, %p520_p12  ;;  %vm539_vm4 = vmand %vm1253_vm0, %vm1261_vm2 }
  0x66   : > { %vm540_vm5 = vmand %vm1257_vm1, %vm1265_vm3 }
  0x69   : > { %508 = vmatpush.bf16.msra.mxu0 %v836_v20 }
  0x6d   : > { %509 = vmatpush.bf16.msra.mxu0 %v835_v21 }
  0x71   : > { %510 = vmatpush.bf16.msra.mxu0 %v834_v22 }
  0x75   : > { %511 = vmatpush.bf16.msra.mxu0 %v833_v23 }
  0x79   : > { %512 = vmatpush.bf16.msra.mxu0 %v832_v24 }
  0x7c   : > { %513 = vmatmul.bf16.vlgmr.msra.gmra.mxu0 %v831_v25 }
  0xf9   : > { %v514_v38 = vpop.f32.mrf.mxu0 }
  0xfd   : > { %554 = sbr.rel (%p1248_p0) target bundleno = 265 (0x109), region = 85 }
 0x101   : > { %v516_v39 = vpop.f32.mrf.mxu0 }
 0x102   : > { %v918_v40 = vld [vmem:[%s1231_s20] ss:$0 sm:$0xff]  ;;  %v556_v42 = vld [vmem:[#allocation2 + $0x8] sm:$0xff] }
 0x103   : > { %v555_v41 = vld [vmem:[#allocation2] sm:$0xff]  ;;  %v561_v43 = vadd.f32 %v918_v40, %v514_v38  ;;  %v562_v44 = vadd.f32 %v918_v40, %v516_v39 }
 0x105   : > { %v563_v45 = vadd.f32 %v561_v43, %v555_v41  ;;  %v564_v46 = vadd.f32 %v562_v44, %v556_v42 }
 0x107   : > { %565 = vst [vmem:[#allocation2] sm:$0xff] %v563_v45 }
 0x108   : > { %566 = vst [vmem:[#allocation2 + $0x8] sm:$0xff] %v564_v46 }
 0x109 PF: > { %586 = sbr.rel (!%p1248_p0) target bundleno = 275 (0x113), region = 93  ;;  %v919_v47 = vld [vmem:[%s1231_s20] ss:$0 sm:$0xff] (%p1248_p0) }
 0x10a   : > { %v593_v49 = vadd.f32 (%p1248_p0), %v919_v47, %v514_v38  ;;  %v594_v51 = vadd.f32 (%p1248_p0), %v919_v47, %v516_v39 }
 0x10c   : > { %v599_v52 = vsel (%p1248_p0), %vm539_vm4, %v593_v49, 0.0  ;;  %v600_v53 = vsel (%p1248_p0), %vm540_vm5, %v594_v51, 0.0 }
 0x10e   : > { %v587_v48 = vld [vmem:[#allocation2] sm:$0xff] }
 0x10f   : > { %v588_v50 = vld [vmem:[#allocation2 + $0x8] sm:$0xff]  ;;  %v601_v54 = vadd.f32 %v599_v52, %v587_v48 }
 0x110   : > { %v602_v55 = vadd.f32 %v600_v53, %v588_v50 }
 0x111   : > { %603 = vst [vmem:[#allocation2] sm:$0xff] %v601_v54 }
 0x112   : > { %604 = vst [vmem:[#allocation2 + $0x8] sm:$0xff] %v602_v55 }
 0x113 PF: > { %608 = sbr.rel (!%p1235_p11) target bundleno = 283 (0x11b), region = 97 }
 0x118   : > { %v609_v56 = vld [vmem:[#allocation2] sm:$0xff] }
 0x119   : > { %v610_v57 = vld [vmem:[#allocation2 + $0x8] sm:$0xff]  ;;  %611 = vst [vmem:[%s1241_s26] sm:$0xff] %v609_v56 }
 0x11a   : > { %612 = vst [vmem:[%s1241_s26 + $0x8] sm:$0xff] %v610_v57 }
 0x11b PF: > { %619 = sbr.rel (!%p1168_p8) target bundleno = 295 (0x127), region = 101  ;;  %s620_s20 = sld [smem:[#allocation4 + %s1024_s18]] (%p1168_p8) }
 0x120   : > { %v656_v58 = vld [vmem:[%s1241_s26] sm:$0xff] }
 0x121   : > { %s840_s0 = sshll.u32 %s620_s20, 2  ;;  %v658_v59 = vld [vmem:[%s1241_s26 + $0x8] sm:$0xff] }
 0x122   : > { %s623_s24 = sadd.s32 %s1028_s19, %s840_s0 }
 0x123   : > { %s828_s8 = sshll.u32 %s623_s24, 3 }
 0x124   : > { %s625_s29 = scalar_lea.vmem %s1337_s7, %s828_s8 }
 0x125   : > { %657 = vst [vmem:[%s625_s29] sm:$0xff] %v656_v58 }
 0x126   : > { %659 = vst [vmem:[%s625_s29 + $0x10] sm:$0xff] %v658_v59 }
 0x127 PF: > { %s40_s21 = sadd.s32 1, %s1040_s21   ;;  %s1363_s18 = sld [smem:[#allocation11_spill]] }
 0x128   : > { %p37_p8 = scmp.ge.s32.totalorder %s40_s21, 10   ;;  %s1364_s19 = sld [smem:[#allocation12_spill]] }
 0x129   : > { %s1365_s3 = sld [smem:[#allocation13_spill]]  ;;  %s1367_s1 = smov %s1012_s16 }
 0x12a   : > { %s1366_s20 = sld [smem:[#allocation14_spill]]  ;;  %s1368_s16 = smov %s1177_s15 }
 0x12b   : > { %s1369_s17 = smov %s1020_s2  ;;  %s1370_s2 = smov %s1173_s12 }
 0x12c   :  { %39 = sbr.rel (!%p37_p8) target bundleno = 17 (0x11), region = 176 }

</bundles_post_ra>
